<compile_context>
chip_gen: v6e
topology: v6e:2x2x1
jax: 0.10.0
libtpu: 0.0.40
codegen_flags: <defaults>
</compile_context>

<pallas_src>
import jax
import jax.numpy as jnp
from jax.experimental import pallas as pl
from jax.experimental.pallas import tpu as pltpu

LANE = 128
BF16_SUBLANE = 16                       # bf16 tiles are (16, 128)
NEG_FILL = -1e30                        # padded action columns -> argmax-safe
VMEM_BUDGET = 28 * 1024 * 1024          # headroom under v7x's 32 MiB scoped default


def _round_up(x, m):
    return (x + m - 1) // m * m


def _cdiv(a, b):
    return -(-a // b)


def dqn_mlp_kernel(x_ref,
                   w1_ref, b1_ref,
                   w2_ref, b2_ref,
                   w3_ref, b3_ref,
                   w4_ref, b4_ref,
                   o_ref):
    """One batch tile of the DQN MLP.

    x:  (TB, S)        f32 (cast to bf16 in-kernel)
    w1: (S,  H1)  b1: (1, H1)
    w2: (H1, H2)  b2: (1, H2)
    w3: (H2, H3p) b3: (1, H3p)      (H3 zero-padded to a lane multiple)
    w4: (H3p, Ap) b4: (1, Ap)       (A  padded to a lane multiple; dead bias = -1e30)
    out:(TB, Ap)       bf16

    Weights are bf16, biases f32. Every matmul accumulates in f32; bias-add and
    ReLU run on the f32 accumulator; activations are re-cast to bf16 only as MXU
    operands for the next layer.
    """
    compute_dt = w1_ref.dtype

    x = x_ref[...].astype(compute_dt)

    h = jnp.dot(x, w1_ref[...], preferred_element_type=jnp.float32) + b1_ref[...]
    h = jnp.maximum(h, 0.0).astype(compute_dt)      # ReLU (Dropout -> identity, eval)

    h = jnp.dot(h, w2_ref[...], preferred_element_type=jnp.float32) + b2_ref[...]
    h = jnp.maximum(h, 0.0).astype(compute_dt)

    h = jnp.dot(h, w3_ref[...], preferred_element_type=jnp.float32) + b3_ref[...]
    h = jnp.maximum(h, 0.0).astype(compute_dt)

    out = jnp.dot(h, w4_ref[...], preferred_element_type=jnp.float32) + b4_ref[...]
    o_ref[...] = out.astype(o_ref.dtype)


def dqn_forward_padded(x, params, *, max_batch_tile=4096):
    """Batched forward. Returns the lane-dense padded (Bp, 128) bf16 Q-value slab.

    Padded action columns hold NEG_FILL (huge negative) so argmax over the padded
    output is still correct; padded batch rows (if any) are garbage and should be
    ignored by the consumer (rows [B:]).
    """
    (w1, b1), (w2, b2), (w3, b3), (w4, b4) = params
    B, S = x.shape
    Ap = w4.shape[1]                              # lane-padded action dim
    widths = [w1.shape[1], w2.shape[1], w3.shape[1], w4.shape[1]]

    weight_bytes = sum(w.size * w.dtype.itemsize + b.size * b.dtype.itemsize
                       for w, b in params)

    # --- Tile selection -----------------------------------------------------
    # Per-row VMEM estimate: double-buffered x, double-buffered bf16 output, plus
    # ~3x widest-layer f32 activation temporaries the compiler materializes.
    per_row = 2 * S * x.dtype.itemsize + 2 * Ap * 2 + 3 * max(widths) * 4
    vmem_cap = max(BF16_SUBLANE,
                   (VMEM_BUDGET - weight_bytes) // per_row
                   // BF16_SUBLANE * BF16_SUBLANE)
    max_tile = min(max_batch_tile, vmem_cap)

    # Even batch split (pad waste < one tile's sublane rounding); force >=2 grid
    # steps when the batch is big enough so both v7x TensorCores get work.
    num_tiles = _cdiv(B, max_tile)
    if num_tiles == 1 and B > 2 * BF16_SUBLANE:
        num_tiles = 2
    TB = _round_up(_cdiv(B, num_tiles), BF16_SUBLANE)
    num_tiles = _cdiv(B, TB)
    Bp = num_tiles * TB
    if Bp != B:
        # Tiny (<= 31 rows) pad; typical power-of-two batches hit Bp == B exactly.
        x = jnp.pad(x, ((0, Bp - B), (0, 0)))

    dims = [S] + widths
    flops = 2 * Bp * sum(dims[i] * dims[i + 1] for i in range(len(dims) - 1))
    bytes_accessed = x.size * x.dtype.itemsize + weight_bytes + Bp * Ap * 2

    def resident(arr):
        # Weight/bias block spec: full array, index_map ignores the batch grid index
        # so the tile is not re-fetched each grid step.
        return pl.BlockSpec(arr.shape, lambda i: (0,) * arr.ndim)

    out = pl.pallas_call(
        dqn_mlp_kernel,
        out_shape=jax.ShapeDtypeStruct((Bp, Ap), jnp.bfloat16),
        grid=(num_tiles,),
        in_specs=[
            pl.BlockSpec((TB, S), lambda i: (i, 0)),
            resident(w1), resident(b1),
            resident(w2), resident(b2),
            resident(w3), resident(b3),
            resident(w4), resident(b4),
        ],
        out_specs=pl.BlockSpec((TB, Ap), lambda i: (i, 0)),
        compiler_params=pltpu.CompilerParams(
            dimension_semantics=("parallel",),
            vmem_limit_bytes=32 * 1024 * 1024,
        ),
        cost_estimate=pl.CostEstimate(
            flops=flops, transcendentals=0, bytes_accessed=bytes_accessed),
    )(x, w1, b1, w2, b2, w3, b3, w4, b4)

    return out


def dqn_forward(x, params, action_size, **kwargs):
    """Convenience API: real (B, action_size) Q-values.

    The slice is a separate pass over the padded output; perf-critical consumers
    (e.g. greedy action selection) should call dqn_forward_padded and argmax /
    slice directly on the padded slab (padded columns are -1e30, so argmax is safe).
    """
    B = x.shape[0]
    return dqn_forward_padded(x, params, **kwargs)[:B, :action_size]


def init_params(key, state_size, action_size, hidden_sizes=(256, 128, 64),
                weight_dtype=jnp.bfloat16):
    """nn.Linear-style uniform(-1/sqrt(fan_in), 1/sqrt(fan_in)) init.

    Weights are stored as [in_features, out_features] (PyTorch weight.T) in bf16;
    biases stay f32. Every feature dim except the input is zero-padded up to a lane
    multiple (128) so all matmul outputs are lane-dense. Dead weight columns are
    zero (mathematically inert); the final layer's dead bias columns are NEG_FILL
    so argmax over the padded output never picks a padded action.
    """
    real = [state_size] + list(hidden_sizes) + [action_size]
    padded = [state_size] + [_round_up(s, LANE) for s in real[1:]]
    n_layers = len(real) - 1
    params = []
    for i in range(n_layers):
        fan_in, fan_out = real[i], real[i + 1]
        pin, pout = padded[i], padded[i + 1]
        key, kw, kb = jax.random.split(key, 3)
        bound = float(fan_in) ** -0.5
        w = jax.random.uniform(kw, (fan_in, fan_out), jnp.float32, -bound, bound)
        b = jax.random.uniform(kb, (1, fan_out), jnp.float32, -bound, bound)
        w = jnp.pad(w, ((0, pin - fan_in), (0, pout - fan_out)))
        bias_fill = NEG_FILL if i == n_layers - 1 else 0.0
        b = jnp.pad(b, ((0, 0), (0, pout - fan_out)), constant_values=bias_fill)
        params.append((w.astype(weight_dtype), b))
    return params


def reference_forward(x, params, action_size):
    """Plain-JAX reference with identical dtype handling (eval mode)."""
    h = x
    n = len(params)
    for i, (w, b) in enumerate(params):
        h = jnp.dot(h.astype(w.dtype), w, preferred_element_type=jnp.float32) + b
        if i < n - 1:
            h = jnp.maximum(h, 0.0)
    return h[:, :action_size]


if __name__ == "__main__":
    STATE_SIZE = 32
    ACTION_SIZE = 8
    BATCH = 8

    key = jax.random.PRNGKey(0)
    key, kx = jax.random.split(key)
    x = jax.random.normal(kx, (BATCH, STATE_SIZE), jnp.float32)

    params = init_params(key, STATE_SIZE, ACTION_SIZE)

    out = dqn_forward(x, params, ACTION_SIZE)
    out = jax.block_until_ready(out)

    ref = reference_forward(x, params, ACTION_SIZE)
    assert out.shape == (BATCH, ACTION_SIZE), out.shape
    assert jnp.allclose(out.astype(jnp.float32), ref, atol=3e-2, rtol=3e-2), \
        "mismatch vs reference"

    print("KERNEL_OK")
</pallas_src>

<mosaic_0001>
module attributes {stable_mosaic.version = 11 : i64} {
  func.func @dqn_mlp_kernel(%arg0: i32, %arg1: memref<16x32xf32, #tpu.memory_space<vmem>>, %arg2: memref<32x256xbf16, #tpu.memory_space<vmem>>, %arg3: memref<1x256xf32, #tpu.memory_space<vmem>>, %arg4: memref<256x128xbf16, #tpu.memory_space<vmem>>, %arg5: memref<1x128xf32, #tpu.memory_space<vmem>>, %arg6: memref<128x128xbf16, #tpu.memory_space<vmem>>, %arg7: memref<1x128xf32, #tpu.memory_space<vmem>>, %arg8: memref<128x128xbf16, #tpu.memory_space<vmem>>, %arg9: memref<1x128xf32, #tpu.memory_space<vmem>>, %arg10: memref<16x128xbf16, #tpu.memory_space<vmem>>) attributes {dimension_semantics = [#tpu.dimension_semantics<parallel>], iteration_bounds = array<i64: 1>, scalar_prefetch = 0 : i64, scratch_operands = 0 : i64, tpu.core_type = #tpu.core_type<tc>, window_params = [{transform_indices = @transform_0, window_bounds = array<i64: 16, 32>}, {pipeline_mode = #tpu.pipeline_mode<synchronous>, transform_indices = @transform_1, window_bounds = array<i64: 32, 256>}, {pipeline_mode = #tpu.pipeline_mode<synchronous>, transform_indices = @transform_2, window_bounds = array<i64: 1, 256>}, {pipeline_mode = #tpu.pipeline_mode<synchronous>, transform_indices = @transform_3, window_bounds = array<i64: 256, 128>}, {pipeline_mode = #tpu.pipeline_mode<synchronous>, transform_indices = @transform_4, window_bounds = array<i64: 1, 128>}, {pipeline_mode = #tpu.pipeline_mode<synchronous>, transform_indices = @transform_5, window_bounds = array<i64: 128, 128>}, {pipeline_mode = #tpu.pipeline_mode<synchronous>, transform_indices = @transform_6, window_bounds = array<i64: 1, 128>}, {pipeline_mode = #tpu.pipeline_mode<synchronous>, transform_indices = @transform_7, window_bounds = array<i64: 128, 128>}, {pipeline_mode = #tpu.pipeline_mode<synchronous>, transform_indices = @transform_8, window_bounds = array<i64: 1, 128>}, {transform_indices = @transform_9, window_bounds = array<i64: 16, 128>}]} {
    %c0 = arith.constant 0 : index
    %c0_0 = arith.constant 0 : index
    %0 = vector.load %arg1[%c0, %c0_0] : memref<16x32xf32, #tpu.memory_space<vmem>>, vector<16x32xf32>
    %1 = arith.truncf %0 : vector<16x32xf32> to vector<16x32xbf16>
    %c0_1 = arith.constant 0 : index
    %c0_2 = arith.constant 0 : index
    %2 = vector.load %arg2[%c0_1, %c0_2] : memref<32x256xbf16, #tpu.memory_space<vmem>>, vector<32x256xbf16>
    %cst = arith.constant dense<0.000000e+00> : vector<16x256xf32>
    %3 = tpu.matmul %1, %2, %cst {dimension_numbers = #tpu.dot_dimension_numbers<[1], [0], [0], [1], [0, 0, 1, 1], [], []>} : vector<16x32xbf16>, vector<32x256xbf16>, vector<16x256xf32> -> vector<16x256xf32>
    %c0_3 = arith.constant 0 : index
    %c0_4 = arith.constant 0 : index
    %4 = vector.load %arg3[%c0_3, %c0_4] : memref<1x256xf32, #tpu.memory_space<vmem>>, vector<1x256xf32>
    %5 = vector.broadcast %4 : vector<1x256xf32> to vector<16x256xf32>
    %6 = arith.addf %3, %5 : vector<16x256xf32>
    %cst_5 = arith.constant 0.000000e+00 : f32
    %7 = vector.broadcast %cst_5 : f32 to vector<16x256xf32>
    %8 = arith.maximumf %6, %7 : vector<16x256xf32>
    %9 = arith.truncf %8 : vector<16x256xf32> to vector<16x256xbf16>
    %c0_6 = arith.constant 0 : index
    %c0_7 = arith.constant 0 : index
    %10 = vector.load %arg4[%c0_6, %c0_7] : memref<256x128xbf16, #tpu.memory_space<vmem>>, vector<256x128xbf16>
    %cst_8 = arith.constant dense<0.000000e+00> : vector<16x128xf32>
    %11 = tpu.matmul %9, %10, %cst_8 {dimension_numbers = #tpu.dot_dimension_numbers<[1], [0], [0], [1], [0, 0, 1, 1], [], []>} : vector<16x256xbf16>, vector<256x128xbf16>, vector<16x128xf32> -> vector<16x128xf32>
    %c0_9 = arith.constant 0 : index
    %c0_10 = arith.constant 0 : index
    %12 = vector.load %arg5[%c0_9, %c0_10] : memref<1x128xf32, #tpu.memory_space<vmem>>, vector<1x128xf32>
    %13 = vector.broadcast %12 : vector<1x128xf32> to vector<16x128xf32>
    %14 = arith.addf %11, %13 : vector<16x128xf32>
    %cst_11 = arith.constant 0.000000e+00 : f32
    %15 = vector.broadcast %cst_11 : f32 to vector<16x128xf32>
    %16 = arith.maximumf %14, %15 : vector<16x128xf32>
    %17 = arith.truncf %16 : vector<16x128xf32> to vector<16x128xbf16>
    %c0_12 = arith.constant 0 : index
    %c0_13 = arith.constant 0 : index
    %18 = vector.load %arg6[%c0_12, %c0_13] : memref<128x128xbf16, #tpu.memory_space<vmem>>, vector<128x128xbf16>
    %cst_14 = arith.constant dense<0.000000e+00> : vector<16x128xf32>
    %19 = tpu.matmul %17, %18, %cst_14 {dimension_numbers = #tpu.dot_dimension_numbers<[1], [0], [0], [1], [0, 0, 1, 1], [], []>} : vector<16x128xbf16>, vector<128x128xbf16>, vector<16x128xf32> -> vector<16x128xf32>
    %c0_15 = arith.constant 0 : index
    %c0_16 = arith.constant 0 : index
    %20 = vector.load %arg7[%c0_15, %c0_16] : memref<1x128xf32, #tpu.memory_space<vmem>>, vector<1x128xf32>
    %21 = vector.broadcast %20 : vector<1x128xf32> to vector<16x128xf32>
    %22 = arith.addf %19, %21 : vector<16x128xf32>
    %cst_17 = arith.constant 0.000000e+00 : f32
    %23 = vector.broadcast %cst_17 : f32 to vector<16x128xf32>
    %24 = arith.maximumf %22, %23 : vector<16x128xf32>
    %25 = arith.truncf %24 : vector<16x128xf32> to vector<16x128xbf16>
    %c0_18 = arith.constant 0 : index
    %c0_19 = arith.constant 0 : index
    %26 = vector.load %arg8[%c0_18, %c0_19] : memref<128x128xbf16, #tpu.memory_space<vmem>>, vector<128x128xbf16>
    %cst_20 = arith.constant dense<0.000000e+00> : vector<16x128xf32>
    %27 = tpu.matmul %25, %26, %cst_20 {dimension_numbers = #tpu.dot_dimension_numbers<[1], [0], [0], [1], [0, 0, 1, 1], [], []>} : vector<16x128xbf16>, vector<128x128xbf16>, vector<16x128xf32> -> vector<16x128xf32>
    %c0_21 = arith.constant 0 : index
    %c0_22 = arith.constant 0 : index
    %28 = vector.load %arg9[%c0_21, %c0_22] : memref<1x128xf32, #tpu.memory_space<vmem>>, vector<1x128xf32>
    %29 = vector.broadcast %28 : vector<1x128xf32> to vector<16x128xf32>
    %30 = arith.addf %27, %29 : vector<16x128xf32>
    %31 = arith.truncf %30 : vector<16x128xf32> to vector<16x128xbf16>
    %c0_23 = arith.constant 0 : index
    %c0_24 = arith.constant 0 : index
    %32 = vector.load %arg10[%c0_23, %c0_24] : memref<16x128xbf16, #tpu.memory_space<vmem>>, vector<16x128xbf16>
    tpu.vector_store %arg10[%c0_23, %c0_24], %31 {strides = array<i32>} : memref<16x128xbf16, #tpu.memory_space<vmem>>, vector<16x128xbf16>,
    return
  }
  func.func @transform_0(%arg0: i32) -> (i32, i32) {
    %c0_i32 = arith.constant 0 : i32
    %c0_i32_0 = arith.constant 0 : i32
    return %arg0, %c0_i32 : i32, i32
  }
  func.func @transform_1(%arg0: i32) -> (i32, i32) {
    %c0_i32 = arith.constant 0 : i32
    %c0_i32_0 = arith.constant 0 : i32
    %c0_i32_1 = arith.constant 0 : i32
    return %c0_i32, %c0_i32_0 : i32, i32
  }
  func.func @transform_2(%arg0: i32) -> (i32, i32) {
    %c0_i32 = arith.constant 0 : i32
    %c0_i32_0 = arith.constant 0 : i32
    %c0_i32_1 = arith.constant 0 : i32
    return %c0_i32, %c0_i32_0 : i32, i32
  }
  func.func @transform_3(%arg0: i32) -> (i32, i32) {
    %c0_i32 = arith.constant 0 : i32
    %c0_i32_0 = arith.constant 0 : i32
    %c0_i32_1 = arith.constant 0 : i32
    return %c0_i32, %c0_i32_0 : i32, i32
  }
  func.func @transform_4(%arg0: i32) -> (i32, i32) {
    %c0_i32 = arith.constant 0 : i32
    %c0_i32_0 = arith.constant 0 : i32
    %c0_i32_1 = arith.constant 0 : i32
    return %c0_i32, %c0_i32_0 : i32, i32
  }
  func.func @transform_5(%arg0: i32) -> (i32, i32) {
    %c0_i32 = arith.constant 0 : i32
    %c0_i32_0 = arith.constant 0 : i32
    %c0_i32_1 = arith.constant 0 : i32
    return %c0_i32, %c0_i32_0 : i32, i32
  }
  func.func @transform_6(%arg0: i32) -> (i32, i32) {
    %c0_i32 = arith.constant 0 : i32
    %c0_i32_0 = arith.constant 0 : i32
    %c0_i32_1 = arith.constant 0 : i32
    return %c0_i32, %c0_i32_0 : i32, i32
  }
  func.func @transform_7(%arg0: i32) -> (i32, i32) {
    %c0_i32 = arith.constant 0 : i32
    %c0_i32_0 = arith.constant 0 : i32
    %c0_i32_1 = arith.constant 0 : i32
    return %c0_i32, %c0_i32_0 : i32, i32
  }
  func.func @transform_8(%arg0: i32) -> (i32, i32) {
    %c0_i32 = arith.constant 0 : i32
    %c0_i32_0 = arith.constant 0 : i32
    %c0_i32_1 = arith.constant 0 : i32
    return %c0_i32, %c0_i32_0 : i32, i32
  }
  func.func @transform_9(%arg0: i32) -> (i32, i32) {
    %c0_i32 = arith.constant 0 : i32
    %c0_i32_0 = arith.constant 0 : i32
    return %arg0, %c0_i32 : i32, i32
  }
}

</mosaic_0001>

<bundles_post_ra>
// kernel: tpu_custom_call.1
= control target key start
LH: loop header
LB: loop body
LE: loop exit
PB: predicated region body
PF: predicated region fallthrough
CT: control target
= control target key end

     0   :  { %14 = vsyncpa [#allocation3], 0  ;;  %s1060_s0 = inlined_call_operand.hbm [shape: f32[16,32], index: 0, kind: input, shape index: {}]   ;;  %s1061_s1 = inlined_call_operand.hbm [shape: bf16[32,256], index: 1, kind: input, shape index: {}]   ;;  %s1062_s2 = inlined_call_operand.vmem [shape: f32[1,256], index: 2, kind: input, shape index: {}]   ;;  %s1063_s3 = inlined_call_operand.hbm [shape: bf16[256,128], index: 3, kind: input, shape index: {}]   ;;  %s1064_s4 = inlined_call_operand.vmem [shape: f32[1,128], index: 4, kind: input, shape index: {}]   ;;  %s1065_s5 = inlined_call_operand.hbm [shape: bf16[128,128], index: 5, kind: input, shape index: {}]   ;;  %s1066_s6 = inlined_call_operand.vmem [shape: f32[1,128], index: 6, kind: input, shape index: {}]   ;;  %s1067_s7 = inlined_call_operand.hbm [shape: bf16[128,128], index: 7, kind: input, shape index: {}]   ;;  %s1068_s8 = inlined_call_operand.vmem [shape: f32[1,128], index: 8, kind: input, shape index: {}]   ;;  %s1069_s9 = inlined_call_operand.hbm [shape: bf16[16,128], index: 9, kind: output, shape index: {}]  }
   0x1   :  { %15 = vsyncpa [#allocation6], 0 }
   0x2   :  { %16 = vsyncpa [#allocation9], 0 }
   0x3   :  { %17 = vsyncpa [#allocation4], 0  ;;  %s937_s30 = smov [#allocation5]  }
   0x4   :  { %s35_s10 = sshll.u32 %s937_s30, 4  ;;  %s36_s10 = int_to_ptr.vmem [resolvable:$true] %s35_s10 }
   0x5   :  { %s817_s11 = scalar_lea.vmem %s36_s10, 512  ;;  %p822_p1 = scmp.lt.s32.totalorder %s36_s10, %s36_s10 }
   0x6   :  { %p818_p0 = scmp.ne.s32.totalorder %s36_s10, %s817_s11  ;;  %p823_p2 = scmp.lt.s32.totalorder %s817_s11, %s817_s11 }
   0x8   :  { %p824_p3 = por %p823_p2, %p822_p1 }
   0xa   :  { %p825_p4 = pnand %p824_p3, %p818_p0 }
   0xc   :  { %828 = shalt.err (!%p825_p4)
}
   0xd   :  { %s938_s12 = smov 128   ;;  %s939_s13 = smov 8  }
   0xe   :  { %41 = dma.hbm_to_vmem [thread:$0]  %s1061_s1, 512, %s36_s10, [#allocation6], %s938_s12, %s938_s12, %s939_s13  }
   0xf   :  { %s940_s16 = smov [#allocation8]   ;;  %s941_s18 = smov [#allocation2]  }
  0x10   :  { %s63_s17 = sshll.u32 %s940_s16, 4  ;;  %s23_s19 = sshll.u32 %s941_s18, 4  ;;  %s64_s17 = int_to_ptr.vmem [resolvable:$true] %s63_s17  ;;  %s24_s19 = int_to_ptr.vmem [resolvable:$true] %s23_s19 }
  0x11   :  { %s837_s20 = scalar_lea.vmem %s64_s17, 1024  ;;  %p842_p6 = scmp.lt.s32.totalorder %s64_s17, %s64_s17 }
  0x12   :  { %p838_p5 = scmp.ne.s32.totalorder %s64_s17, %s837_s20  ;;  %p843_p7 = scmp.lt.s32.totalorder %s837_s20, %s837_s20 }
  0x14   :  { %p844_p8 = por %p843_p7, %p842_p6 }
  0x16   :  { %p845_p9 = pnand %p844_p8, %p838_p5 }
  0x18   :  { %848 = shalt.err (!%p845_p9)
}
  0x19   :  { %s942_s21 = smov 64   ;;  %s943_s22 = smov 4  }
  0x1a   :  { %69 = dma.hbm_to_vmem [thread:$0]  %s1065_s5, 1024, %s64_s17, [#allocation9], %s942_s21, %s942_s21, %s943_s22  }
  0x1b   :  { %s857_s1 = scalar_lea.vmem %s24_s19, 256  ;;  %p862_p11 = scmp.lt.s32.totalorder %s24_s19, %s24_s19 }
  0x1c   :  { %p858_p10 = scmp.ne.s32.totalorder %s24_s19, %s857_s1  ;;  %p863_p12 = scmp.lt.s32.totalorder %s857_s1, %s857_s1 }
  0x1e   :  { %p864_p13 = por %p863_p12, %p862_p11 }
  0x20   :  { %p865_p0 = pnand %p864_p13, %p858_p10 }
  0x22   :  { %868 = shalt.err (!%p865_p0)
}
  0x23   :  { %29 = dma.hbm_to_vmem [thread:$0]  %s1060_s0, 256, %s24_s19, [#allocation3], %s938_s12, %s938_s12, %s939_s13  }
  0x24   :  { %s944_s27 = smov [#allocation7]   ;;  %s945_s29 = smov [#allocation10]  }
  0x25   :  { %s49_s28 = sshll.u32 %s944_s27, 4  ;;  %s77_s30 = sshll.u32 %s945_s29, 4  ;;  %s50_s28 = int_to_ptr.vmem [resolvable:$true] %s49_s28  ;;  %s78_s30 = int_to_ptr.vmem [resolvable:$true] %s77_s30 }
  0x26   :  { %s877_s10 = scalar_lea.vmem %s50_s28, 2048  ;;  %p882_p2 = scmp.lt.s32.totalorder %s50_s28, %s50_s28 }
  0x27   :  { %p878_p1 = scmp.ne.s32.totalorder %s50_s28, %s877_s10  ;;  %p883_p3 = scmp.lt.s32.totalorder %s877_s10, %s877_s10 }
  0x29   :  { %p884_p4 = por %p883_p3, %p882_p2 }
  0x2b   :  { %p885_p5 = pnand %p884_p4, %p878_p1 }
  0x2d   :  { %888 = shalt.err (!%p885_p5)
}
  0x2e   :  { %55 = dma.hbm_to_vmem [thread:$0]  %s1063_s3, 2048, %s50_s28, [#allocation6], %s942_s21, %s942_s21, %s943_s22  }
  0x2f   :  { %s897_s0 = scalar_lea.vmem %s78_s30, 1024  ;;  %p902_p7 = scmp.lt.s32.totalorder %s78_s30, %s78_s30 }
  0x30   :  { %p898_p6 = scmp.ne.s32.totalorder %s78_s30, %s897_s0  ;;  %p903_p8 = scmp.lt.s32.totalorder %s897_s0, %s897_s0 }
  0x32   :  { %p904_p9 = por %p903_p8, %p902_p7 }
  0x34   :  { %p905_p10 = pnand %p904_p9, %p898_p6 }
  0x36   :  { %908 = shalt.err (!%p905_p10)
}
  0x37   :  { %83 = dma.hbm_to_vmem [thread:$0]  %s1067_s7, 1024, %s78_s30, [#allocation9], %s942_s21, %s942_s21, %s943_s22  }
  0x38   :  { %929 = dma.done.wait [#allocation3], 256  }
  0x39   :  { %930 = vsyncadd [#allocation3], 4294967040 }
  0x3a   :  { %931 = dma.done.wait [#allocation6], 2560  }
  0x3b   :  { %932 = vsyncadd [#allocation6], 4294964736 }
  0x3c   :  { %933 = dma.done.wait [#allocation9], 2048  }
  0x3d   :  { %934 = vsyncadd [#allocation9], 4294965248  ;;  %v946_v0 = vmov 0   ;;  %v771_v1 = vld [vmem:[#allocation5 + $0x14] ss:$8 sps:$4 sm:$0xff]   ;;  %vm141_vm0 = vcmask 261120   ;;  %v111_v29 = vlaneseq }
  0x3e   :  { %177 = vmatprep.mubr.bf16.mxu0 %v946_v0  ;;  %v773_v2 = vld [vmem:[#allocation5 + $0x10] ss:$8 sps:$4 sm:$0xff]   ;;  %157 = vmatprep.subr.bf16.mxu0 %v771_v1  ;;  %v774_v3 = vld [vmem:[#allocation5 + $0x4] ss:$8 sps:$4 sm:$0xff]   ;;  %v776_v4 = vld [vmem:[#allocation5] ss:$8 sps:$4 sm:$0xff]  }
  0x3f   :  { %v102_v5 = vld [vmem:[#allocation2] sm:$0xff]  ;;  %158 = vmatpush1.bf16.msra.mxu0 %v773_v2  ;;  %v103_v6 = vld [vmem:[#allocation2 + $0x8] sm:$0xff]  ;;  %v781_v12 = vld [vmem:[#allocation7 + $0x68] sm:$0xff]   ;;  %v947_v25 = vmov 0.0   ;;  %v112_v30 = vshrl.u32 %v111_v29, 7  ;;  %vm948_vm1 = vmmov 0  }
  0x40   :  { %159 = vmatprep.subr.bf16.mxu0 %v774_v3  ;;  %v777_v7 = vld [vmem:[#allocation7 + $0x78] sm:$0xff]   ;;  %v104_v9 = vpack.c.bf16 %v103_v6, %v102_v5  ;;  %v779_v10 = vld [vmem:[#allocation7 + $0x70] sm:$0xff]   ;;  %v782_v13 = vld [vmem:[#allocation7 + $0x28] sm:$0xff]   ;;  %s949_s18 = smov [#allocation11]  }
  0x41   :  { %v778_v8 = vld [vmem:[#allocation7 + $0x38] sm:$0xff]   ;;  %678 = vmatprep.subr.bf16.mxu1 %v777_v7  ;;  %v780_v11 = vld [vmem:[#allocation7 + $0x30] sm:$0xff]   ;;  %v783_v14 = vld [vmem:[#allocation7 + $0x60] sm:$0xff]   ;;  %v117_v31 = vsub.s32 1, %v112_v30  ;;  %v113_v32 = vsub.s32 0, %v112_v30  ;;  %s615_s19 = sshll.u32 %s949_s18, 4  ;;  %s616_s19 = int_to_ptr.vmem [resolvable:$true] %s615_s19 }
  0x42   :  { %679 = vmatpush3.bf16.msra.mxu1 %v778_v8  ;;  %v784_v15 = vld [vmem:[#allocation7 + $0x20] sm:$0xff]   ;;  %v785_v16 = vld [vmem:[#allocation7 + $0x58] sm:$0xff]   ;;  %v787_v18 = vld [vmem:[#allocation7 + $0x50] sm:$0xff]   ;;  %p914_p12 = scmp.lt.s32.totalorder %s616_s19, %s616_s19 }
  0x43   :  { %160 = vmatpush1.bf16.msra.mxu0 %v776_v4  ;;  %680 = vmatprep.subr.bf16.mxu1 %v779_v10  ;;  %v786_v17 = vld [vmem:[#allocation7 + $0x18] sm:$0xff]   ;;  %v788_v19 = vld [vmem:[#allocation7 + $0x10] sm:$0xff]   ;;  %v789_v20 = vld [vmem:[#allocation7 + $0x48] sm:$0xff]  }
  0x44   :  { %v790_v21 = vld [vmem:[#allocation7 + $0x8] sm:$0xff]   ;;  %v791_v22 = vld [vmem:[#allocation7 + $0x40] sm:$0xff]   ;;  %v793_v24 = vld [vmem:[#allocation8 + $0x38] sm:$0xff]   ;;  %718 = vmatprep.subr.bf16.mxu0 %v947_v25 }
  0x45   :  { %v792_v23 = vld [vmem:[#allocation7] sm:$0xff]   ;;  %v794_v26 = vld [vmem:[#allocation8 + $0x30] sm:$0xff]   ;;  %v795_v27 = vld [vmem:[#allocation8 + $0x28] sm:$0xff]  }
  0x46   :  { %633 = vmatmul.mubr.msk.bf16.vlgmr.msra.gmra.mxu0 %vm141_vm0, %v104_v9  ;;  %681 = vmatpush3.bf16.msra.mxu1 %v780_v11  ;;  %v796_v28 = vld [vmem:[#allocation8 + $0x20] sm:$0xff]   ;;  %v109_v33 = vld [vmem:[%s1062_s2] sm:$0x3]  ;;  %v797_v50 = vld [vmem:[#allocation8 + $0x18] sm:$0xff]  }
  0x47   :  { %682 = vmatprep.subr.bf16.mxu1 %v781_v12  ;;  %719 = vmatpush3.bf16.msra.mxu0 %v793_v24  ;;  %v118_v35 = vrot.slane %v109_v33, %v117_v31  ;;  %v114_v36 = vrot.slane %v109_v33, %v113_v32  ;;  %v798_v51 = vld [vmem:[#allocation8 + $0x10] sm:$0xff]   ;;  %v799_v52 = vld [vmem:[#allocation8 + $0x8] sm:$0xff]   ;;  %v800_v53 = vld [vmem:[#allocation8] sm:$0xff]  }
  0x48   :  { %720 = vmatprep.subr.bf16.mxu0 %v947_v25  ;;  %734 = vmatprep.mubr.msk.bf16.mxu0 %vm948_vm1, %v947_v25  ;;  %v801_v54 = vld [vmem:[#allocation10 + $0x38] sm:$0xff]   ;;  %v802_v55 = vld [vmem:[#allocation10 + $0x30] sm:$0xff]   ;;  %v803_v56 = vld [vmem:[#allocation10 + $0x28] sm:$0xff]  }
  0x49   :  { %v804_v57 = vld [vmem:[#allocation10 + $0x20] sm:$0xff]   ;;  %v805_v58 = vld [vmem:[#allocation10 + $0x18] sm:$0xff]   ;;  %v634_v62 = vld [vmem:[%s1064_s4] ss:$0 sm:$0xff] }
  0x4a   :  { %683 = vmatpush3.bf16.msra.mxu1 %v782_v13  ;;  %v806_v7 = vld [vmem:[#allocation10 + $0x10] sm:$0xff]   ;;  %v807_v8 = vld [vmem:[#allocation10 + $0x8] sm:$0xff]   ;;  %v808_v9 = vld [vmem:[#allocation10] sm:$0xff]  }
  0x4b   :  { %684 = vmatprep.subr.bf16.mxu1 %v783_v14  ;;  %721 = vmatpush3.bf16.msra.mxu0 %v794_v26  ;;  %v651_v10 = vld [vmem:[%s1066_s6] ss:$0 sm:$0xff]  ;;  %s909_s6 = scalar_lea.vmem %s616_s19, 128 }
  0x4c   :  { %722 = vmatprep.subr.bf16.mxu0 %v947_v25  ;;  %p910_p11 = scmp.ne.s32.totalorder %s616_s19, %s909_s6  ;;  %p915_p13 = scmp.lt.s32.totalorder %s909_s6, %s909_s6 }
  0x4e   :  { %685 = vmatpush3.bf16.msra.mxu1 %v784_v15  ;;  %p916_p0 = por %p915_p13, %p914_p12 }
  0x4f   :  { %686 = vmatprep.subr.bf16.mxu1 %v785_v16  ;;  %723 = vmatpush3.bf16.msra.mxu0 %v795_v27 }
  0x50   :  { %724 = vmatprep.subr.bf16.mxu0 %v947_v25  ;;  %p917_p1 = pnand %p916_p0, %p910_p11 }
  0x52   :  { %687 = vmatpush3.bf16.msra.mxu1 %v786_v17 }
  0x53   :  { %688 = vmatprep.subr.bf16.mxu1 %v787_v18  ;;  %725 = vmatpush3.bf16.msra.mxu0 %v796_v28 }
  0x54   :  { %726 = vmatprep.subr.bf16.mxu0 %v947_v25 }
  0x56   :  { %689 = vmatpush3.bf16.msra.mxu1 %v788_v19 }
  0x57   :  { %690 = vmatprep.subr.bf16.mxu1 %v789_v20  ;;  %727 = vmatpush3.bf16.msra.mxu0 %v797_v50 }
  0x58   :  { %728 = vmatprep.subr.bf16.mxu0 %v947_v25 }
  0x5a   :  { %691 = vmatpush3.bf16.msra.mxu1 %v790_v21  ;;  %v660_v21 = vld [vmem:[%s1068_s8] ss:$0 sm:$0xff] }
  0x5b   :  { %692 = vmatprep.subr.bf16.mxu1 %v791_v22  ;;  %729 = vmatpush3.bf16.msra.mxu0 %v798_v51 }
  0x5c   :  { %730 = vmatprep.subr.bf16.mxu0 %v947_v25 }
  0x5e   :  { %693 = vmatpush3.bf16.msra.mxu1 %v792_v23 }
  0x5f   :  { %738 = vmatprep.subr.bf16.mxu1 %v947_v25  ;;  %731 = vmatpush3.bf16.msra.mxu0 %v799_v52 }
  0x60   :  { %732 = vmatprep.subr.bf16.mxu0 %v947_v25 }
  0x63   :  { %733 = vmatpush3.bf16.msra.mxu0 %v800_v53 }
 0x106   :  { %v179_v34 = vpop.f32.mrf.mxu0 }
 0x107   :  { %v180_v41 = vadd.f32 %v179_v34, %v114_v36 }
 0x108   :  { %v181_v37 = vpop.f32.mrf.mxu0 }
 0x109   :  { %v182_v39 = vadd.f32 %v181_v37, %v118_v35  ;;  %v188_v47 = vmax.f32 %v180_v41, 0.0 }
 0x10a   :  { %v183_v38 = vpop.f32.mrf.mxu0 }
 0x10b   :  { %v184_v40 = vadd.f32 %v183_v38, %v114_v36  ;;  %v189_v45 = vmax.f32 %v182_v39, 0.0 }
 0x10c   :  { %v185_v42 = vpop.f32.mrf.mxu0 }
 0x10d   :  { %v186_v43 = vadd.f32 %v185_v42, %v118_v35  ;;  %v190_v44 = vmax.f32 %v184_v40, 0.0 }
 0x10f   :  { %v191_v46 = vmax.f32 %v186_v43, 0.0  ;;  %v192_v49 = vpack.c.bf16 %v190_v44, %v188_v47 }
 0x111   :  { %v193_v48 = vpack.c.bf16 %v191_v46, %v189_v45 }
 0x113   :  { %361 = vmatprep.mubr.bf16.mxu1 %v193_v48 }
 0x114   :  { %362 = vmatmul.mubr.bf16.vlgmr.msra.gmra.mxu1 %v192_v49 }
 0x115   :  { %754 = vmatprep.mubr.msk.bf16.mxu1 %vm948_vm1, %v947_v25  ;;  %739 = vmatpush3.bf16.msra.mxu1 %v801_v54 }
 0x116   :  { %740 = vmatprep.subr.bf16.mxu1 %v947_v25 }
 0x119   :  { %741 = vmatpush3.bf16.msra.mxu1 %v802_v55 }
 0x11a   :  { %742 = vmatprep.subr.bf16.mxu1 %v947_v25 }
 0x11d   :  { %743 = vmatpush3.bf16.msra.mxu1 %v803_v56 }
 0x11e   :  { %744 = vmatprep.subr.bf16.mxu1 %v947_v25 }
 0x121   :  { %745 = vmatpush3.bf16.msra.mxu1 %v804_v57 }
 0x122   :  { %746 = vmatprep.subr.bf16.mxu1 %v947_v25 }
 0x125   :  { %747 = vmatpush3.bf16.msra.mxu1 %v805_v58 }
 0x126   :  { %748 = vmatprep.subr.bf16.mxu1 %v947_v25 }
 0x129   :  { %749 = vmatpush3.bf16.msra.mxu1 %v806_v7 }
 0x12a   :  { %750 = vmatprep.subr.bf16.mxu1 %v947_v25 }
 0x12d   :  { %751 = vmatpush3.bf16.msra.mxu1 %v807_v8 }
 0x12e   :  { %752 = vmatprep.subr.bf16.mxu1 %v947_v25 }
 0x131   :  { %753 = vmatpush3.bf16.msra.mxu1 %v808_v9 }
 0x1d4   :  { %v694_v59 = vpop.f32.mrf.mxu1 }
 0x1d6   :  { %v695_v60 = vpop.f32.mrf.mxu1 }
 0x1d7   :  { %v696_v61 = vadd.f32 %v695_v60, %v694_v59 }
 0x1d8   :  { %v697_v63 = vpop.f32.mrf.mxu1 }
 0x1d9   :  { %v364_v1 = vadd.f32 %v696_v61, %v634_v62 }
 0x1da   :  { %v698_v0 = vpop.f32.mrf.mxu1 }
 0x1db   :  { %v699_v2 = vadd.f32 %v698_v0, %v697_v63  ;;  %v370_v4 = vmax.f32 %v364_v1, 0.0 }
 0x1dd   :  { %v367_v3 = vadd.f32 %v699_v2, %v634_v62 }
 0x1df   :  { %v371_v5 = vmax.f32 %v367_v3, 0.0 }
 0x1e1   :  { %v372_v6 = vpack.c.bf16 %v371_v5, %v370_v4 }
 0x1e3   :  { %735 = vmatmul.mubr.bf16.vlgmr.msra.gmra.mxu0 %v372_v6 }
 0x2a3   :  { %v478_v11 = vpop.f32.mrf.mxu0 }
 0x2a4   :  { %v479_v13 = vadd.f32 %v651_v10, %v478_v11 }
 0x2a5   :  { %v736_v12 = vpop.f32.mrf.mxu0 }
 0x2a6   :  { %v485_v17 = vmax.f32 %v479_v13, 0.0 }
 0x2a7   :  { %v481_v14 = vpop.f32.mrf.mxu0 }
 0x2a8   :  { %v482_v15 = vadd.f32 %v651_v10, %v481_v14 }
 0x2a9   :  { %v737_v16 = vpop.f32.mrf.mxu0 }
 0x2aa   :  { %v486_v18 = vmax.f32 %v482_v15, 0.0 }
 0x2ac   :  { %v487_v19 = vpack.c.bf16 %v486_v18, %v485_v17 }
 0x2ae   :  { %755 = vmatmul.mubr.bf16.vlgmr.msra.gmra.mxu1 %v487_v19 }
 0x36e   :  { %v593_v20 = vpop.f32.mrf.mxu1 }
 0x36f   :  { %v594_v24 = vadd.f32 %v660_v21, %v593_v20 }
 0x370   :  { %v756_v22 = vpop.f32.mrf.mxu1 }
 0x372   :  { %v596_v23 = vpop.f32.mrf.mxu1 }
 0x373   :  { %v597_v25 = vadd.f32 %v660_v21, %v596_v23 }
 0x374   :  { %v757_v26 = vpop.f32.mrf.mxu1 }
 0x375   :  { %v676_v27 = vpack.c.bf16 %v597_v25, %v594_v24 }
 0x377   :  { %677 = vst [vmem:[#allocation11] sm:$0xff] %v676_v27  }
 0x378   :  { %920 = shalt.err (!%p917_p1)
}
 0x379   :  { %621 = dma.vmem_to_hbm [thread:$0]  %s616_s19, 128, %s1069_s9, [#allocation4], %s942_s21, %s942_s21, %s943_s22  }
 0x37a   :  { %935 = dma.done.wait [#allocation4], 128  }
 0x37b   :  { %936 = vsyncadd [#allocation4], 4294967168 }
 0x37c   :  { %625 = vsyncpa [#allocation3], 1 }
 0x37d   :  { %626 = vsyncpa [#allocation6], 1 }
 0x37e   :  { %627 = vsyncpa [#allocation9], 1 }
 0x37f   :  { %628 = vsyncpa [#allocation4], 1 }

</bundles_post_ra>
